<compile_context>
chip_gen: v6e
topology: v6e:2x2x1
jax: 0.10.0
libtpu: 0.0.40
codegen_flags: <defaults>
</compile_context>

<pallas_src>
import jax
import jax.numpy as jnp
from jax.experimental import pallas as pl
from jax.experimental.pallas import tpu as pltpu


def lin_relu_kernel(x_ref, y_ref, w_ref, b_ref, o_ref):
    # add (VPU, f32) -> matmul (MXU, f32 accumulate) -> bias + relu (VPU),
    # fully VMEM-resident per batch tile. Upcast after load so bf16-in-HBM
    # storage works on v5e (no bf16 VPU) and keeps f32 accuracy everywhere.
    x = x_ref[...].astype(jnp.float32)
    y = y_ref[...].astype(jnp.float32)
    w = w_ref[...].astype(jnp.float32)
    b = b_ref[...].astype(jnp.float32)
    s = x + y                                                        # (TB, K)
    acc = jnp.dot(s, w, preferred_element_type=jnp.float32)          # (TB, N)
    o_ref[...] = jnp.maximum(acc + b, 0.0).astype(o_ref.dtype)


def prepare_params(weight, bias, storage_dtype=None):
    """One-time parameter prep (hoisted out of the per-call forward path).

    weight: (out_f, in_f) PyTorch layout; bias: (out_f,).
    Returns (w_t, b_row):
      w_t:   (in_f, out_f), optionally cast to `storage_dtype` (e.g. bf16 to
             halve its HBM footprint alongside bf16 activations).
      b_row: (1, out_f) kept in f32 (negligible bytes, preserves accuracy).
    """
    w_t = jnp.transpose(weight)                # (in_f, out_f)
    if storage_dtype is not None:
        w_t = w_t.astype(storage_dtype)
    b_row = bias.reshape(1, -1).astype(jnp.float32)
    return w_t, b_row


def _round_up(n, m):
    return -(-n // m) * m


def my_module_forward(x, y, w_t, b_row, *, max_block_rows=1024,
                      out_dtype=jnp.float32):
    """x, y: (B, in_f), any float dtype (f32 or bf16). Params from prepare_params()."""
    B, in_f = x.shape
    out_f = w_t.shape[1]

    # Batch tile: aim for >=2 grid steps when B allows (engages both TCs on
    # v7x via the "parallel" axis), 8-aligned, capped at max_block_rows.
    tb = min(max_block_rows, _round_up(pl.cdiv(B, 2), 8))
    tb = min(tb, B)  # tiny batches: single full-size block
    grid = (pl.cdiv(B, tb),)

    # Scoped-VMEM guard: only relevant if the caller pushes tb far past the
    # default (v5e scoped default is 16 MiB); a no-op at tb <= 1024.
    itemsize = jnp.dtype(x.dtype).itemsize
    working = (2 * (2 * tb * in_f * itemsize)        # x, y double-buffered
               + 2 * (tb * out_f * 4)                # output double-buffered
               + in_f * out_f * itemsize + out_f * 4)  # resident weight + bias
    cparams = dict(dimension_semantics=("parallel",))
    if working > 12 * 1024 * 1024:
        cparams["vmem_limit_bytes"] = int(working * 1.5) + (4 << 20)

    return pl.pallas_call(
        lin_relu_kernel,
        out_shape=jax.ShapeDtypeStruct((B, out_f), out_dtype),
        grid=grid,
        in_specs=[
            pl.BlockSpec((tb, in_f), lambda i: (i, 0)),
            pl.BlockSpec((tb, in_f), lambda i: (i, 0)),
            # Constant index_maps: weight / bias blocks stay VMEM-resident
            # across all batch grid steps (no re-DMA per step).
            pl.BlockSpec((in_f, out_f), lambda i: (0, 0)),
            pl.BlockSpec((1, out_f), lambda i: (0, 0)),
        ],
        # Real-width output block: no lane padding, no post-kernel slice pass.
        out_specs=pl.BlockSpec((tb, out_f), lambda i: (i, 0)),
        compiler_params=pltpu.CompilerParams(**cparams),
    )(x, y, w_t, b_row)


def reference_forward(x, y, weight, bias):
    return jnp.maximum((x + y) @ weight.T + bias, 0.0)


if __name__ == "__main__":
    key = jax.random.PRNGKey(0)
    k_x, k_y, k_w, k_b = jax.random.split(key, 4)

    B, IN_F, OUT_F = 8, 100, 10

    # torch.nn.Linear default init: U(-1/sqrt(in_f), 1/sqrt(in_f)).
    bound = 1.0 / jnp.sqrt(jnp.float32(IN_F))
    weight = jax.random.uniform(k_w, (OUT_F, IN_F), jnp.float32, -bound, bound)
    bias = jax.random.uniform(k_b, (OUT_F,), jnp.float32, -bound, bound)

    x = jax.random.normal(k_x, (B, IN_F), jnp.float32)
    y = jax.random.normal(k_y, (B, IN_F), jnp.float32)

    ref = reference_forward(x, y, weight, bias)

    # --- f32 I/O path (exact) ---
    w_t, b_row = prepare_params(weight, bias)
    out = my_module_forward(x, y, w_t, b_row)
    out = jax.block_until_ready(out)
    assert out.shape == (B, OUT_F), out.shape
    assert jnp.allclose(out, ref, atol=1e-5, rtol=1e-5), "f32 mismatch vs reference"

    # --- bf16-in-HBM I/O path (halves input HBM traffic at large B on v6e/v7x;
    #     kernel upcasts to f32 and accumulates in f32) ---
    w_t_bf, b_row_bf = prepare_params(weight, bias, storage_dtype=jnp.bfloat16)
    out_bf = my_module_forward(x.astype(jnp.bfloat16), y.astype(jnp.bfloat16),
                               w_t_bf, b_row_bf)
    out_bf = jax.block_until_ready(out_bf)
    assert out_bf.shape == (B, OUT_F), out_bf.shape
    assert jnp.allclose(out_bf, ref, atol=5e-2, rtol=5e-2), "bf16 mismatch vs reference"

    print("KERNEL_OK")
</pallas_src>

<mosaic_0001>
module attributes {stable_mosaic.version = 11 : i64} {
  func.func @lin_relu_kernel(%arg0: i32, %arg1: memref<8x100xf32, #tpu.memory_space<vmem>>, %arg2: memref<8x100xf32, #tpu.memory_space<vmem>>, %arg3: memref<100x10xf32, #tpu.memory_space<vmem>>, %arg4: memref<1x10xf32, #tpu.memory_space<vmem>>, %arg5: memref<8x10xf32, #tpu.memory_space<vmem>>) attributes {dimension_semantics = [#tpu.dimension_semantics<parallel>], iteration_bounds = array<i64: 1>, scalar_prefetch = 0 : i64, scratch_operands = 0 : i64, tpu.core_type = #tpu.core_type<tc>, window_params = [{transform_indices = @transform_0, window_bounds = array<i64: 8, 100>}, {transform_indices = @transform_1, window_bounds = array<i64: 8, 100>}, {pipeline_mode = #tpu.pipeline_mode<synchronous>, transform_indices = @transform_2, window_bounds = array<i64: 100, 10>}, {pipeline_mode = #tpu.pipeline_mode<synchronous>, transform_indices = @transform_3, window_bounds = array<i64: 1, 10>}, {transform_indices = @transform_4, window_bounds = array<i64: 8, 10>}]} {
    %c0 = arith.constant 0 : index
    %c0_0 = arith.constant 0 : index
    %0 = vector.load %arg1[%c0, %c0_0] : memref<8x100xf32, #tpu.memory_space<vmem>>, vector<8x100xf32>
    %c0_1 = arith.constant 0 : index
    %c0_2 = arith.constant 0 : index
    %1 = vector.load %arg2[%c0_1, %c0_2] : memref<8x100xf32, #tpu.memory_space<vmem>>, vector<8x100xf32>
    %c0_3 = arith.constant 0 : index
    %c0_4 = arith.constant 0 : index
    %2 = vector.load %arg3[%c0_3, %c0_4] : memref<100x10xf32, #tpu.memory_space<vmem>>, vector<100x10xf32>
    %c0_5 = arith.constant 0 : index
    %c0_6 = arith.constant 0 : index
    %3 = vector.load %arg4[%c0_5, %c0_6] : memref<1x10xf32, #tpu.memory_space<vmem>>, vector<1x10xf32>
    %4 = arith.addf %0, %1 : vector<8x100xf32>
    %cst = arith.constant dense<0.000000e+00> : vector<8x10xf32>
    %5 = tpu.matmul %4, %2, %cst {dimension_numbers = #tpu.dot_dimension_numbers<[1], [0], [0], [1], [0, 0, 1, 1], [], []>} : vector<8x100xf32>, vector<100x10xf32>, vector<8x10xf32> -> vector<8x10xf32>
    %6 = vector.broadcast %3 : vector<1x10xf32> to vector<8x10xf32>
    %7 = arith.addf %5, %6 : vector<8x10xf32>
    %cst_7 = arith.constant 0.000000e+00 : f32
    %8 = vector.broadcast %cst_7 : f32 to vector<8x10xf32>
    %9 = arith.maximumf %7, %8 : vector<8x10xf32>
    %c0_8 = arith.constant 0 : index
    %c0_9 = arith.constant 0 : index
    %10 = vector.load %arg5[%c0_8, %c0_9] : memref<8x10xf32, #tpu.memory_space<vmem>>, vector<8x10xf32>
    tpu.vector_store %arg5[%c0_8, %c0_9], %9 {strides = array<i32>} : memref<8x10xf32, #tpu.memory_space<vmem>>, vector<8x10xf32>,
    return
  }
  func.func @transform_0(%arg0: i32) -> (i32, i32) {
    %c0_i32 = arith.constant 0 : i32
    %c0_i32_0 = arith.constant 0 : i32
    return %arg0, %c0_i32 : i32, i32
  }
  func.func @transform_1(%arg0: i32) -> (i32, i32) {
    %c0_i32 = arith.constant 0 : i32
    %c0_i32_0 = arith.constant 0 : i32
    return %arg0, %c0_i32 : i32, i32
  }
  func.func @transform_2(%arg0: i32) -> (i32, i32) {
    %c0_i32 = arith.constant 0 : i32
    %c0_i32_0 = arith.constant 0 : i32
    %c0_i32_1 = arith.constant 0 : i32
    return %c0_i32, %c0_i32_0 : i32, i32
  }
  func.func @transform_3(%arg0: i32) -> (i32, i32) {
    %c0_i32 = arith.constant 0 : i32
    %c0_i32_0 = arith.constant 0 : i32
    %c0_i32_1 = arith.constant 0 : i32
    return %c0_i32, %c0_i32_0 : i32, i32
  }
  func.func @transform_4(%arg0: i32) -> (i32, i32) {
    %c0_i32 = arith.constant 0 : i32
    %c0_i32_0 = arith.constant 0 : i32
    return %arg0, %c0_i32 : i32, i32
  }
}

</mosaic_0001>

<bundles_post_ra>
// kernel: tpu_custom_call.1
= control target key start
LH: loop header
LB: loop body
LE: loop exit
PB: predicated region body
PF: predicated region fallthrough
CT: control target
= control target key end

     0   :  { %vm45_vm0 = vcmask 1043456   ;;  %v207_v1 = vmov 0.0   ;;  %vm208_vm1 = vmmov 0   ;;  %s286_s0 = inlined_call_operand.vmem [shape: f32[8,100], index: 0, kind: input, shape index: {}]   ;;  %s287_s1 = inlined_call_operand.vmem [shape: f32[8,100], index: 1, kind: input, shape index: {}]   ;;  %s288_s2 = inlined_call_operand.vmem [shape: f32[100,10], index: 2, kind: input, shape index: {}]   ;;  %s289_s3 = inlined_call_operand.vmem [shape: f32[1,10], index: 3, kind: input, shape index: {}]   ;;  %s290_s4 = inlined_call_operand.hbm [shape: f32[8,10], index: 4, kind: output, shape index: {}]  }
   0x1   :  { %v32_v0 = vld [vmem:[%s288_s2 + $0x60] sm:$0xf]  ;;  %153 = vmatprep.subr.mxu0 %v207_v1  ;;  %v31_v2 = vld [vmem:[%s288_s2 + $0x58] sm:$0xff]  ;;  %179 = vmatprep.mubr.msk.f32.mxu0 %vm208_vm1, %v207_v1  ;;  %v30_v3 = vld [vmem:[%s288_s2 + $0x50] sm:$0xff] }
   0x2   :  { %154 = vmatpush3.msk.msra.mxu0 %vm45_vm0, %v32_v0  ;;  %v29_v4 = vld [vmem:[%s288_s2 + $0x48] sm:$0xff] }
   0x3   :  { %155 = vmatprep.subr.mxu0 %v207_v1 }
   0x4   :  { %156 = vmatpush3.msra.mxu0 %v31_v2 }
   0x5   :  { %157 = vmatprep.subr.mxu0 %v207_v1 }
   0x6   :  { %9 = vsyncpa [#allocation3], 0  ;;  %158 = vmatpush3.msra.mxu0 %v30_v3  ;;  %v28_v5 = vld [vmem:[%s288_s2 + $0x40] sm:$0xff]  ;;  %v27_v6 = vld [vmem:[%s288_s2 + $0x38] sm:$0xff]  ;;  %vm41_vm2 = vcmask 818176   ;;  %vm120_vm3 = vcmask 80896  }
   0x7   :  { %159 = vmatprep.subr.mxu0 %v207_v1  ;;  %v26_v7 = vld [vmem:[%s288_s2 + $0x30] sm:$0xff]  ;;  %v25_v8 = vld [vmem:[%s288_s2 + $0x28] sm:$0xff]  ;;  %v24_v9 = vld [vmem:[%s288_s2 + $0x20] sm:$0xff] }
   0x8   :  { %160 = vmatpush3.msra.mxu0 %v29_v4  ;;  %v23_v10 = vld [vmem:[%s288_s2 + $0x18] sm:$0xff]  ;;  %v22_v11 = vld [vmem:[%s288_s2 + $0x10] sm:$0xff]  ;;  %v18_v12 = vld [vmem:[%s286_s0] sm:$0xff] }
   0x9   :  { %161 = vmatprep.subr.mxu0 %v207_v1  ;;  %v19_v13 = vld [vmem:[%s287_s1] sm:$0xff]  ;;  %v21_v14 = vld [vmem:[%s288_s2 + $0x8] sm:$0xff]  ;;  %s209_s1 = smov [#allocation2]  }
   0xa   :  { %162 = vmatpush3.msra.mxu0 %v28_v5  ;;  %v20_v15 = vld [vmem:[%s288_s2] sm:$0xff]  ;;  %v34_v16 = vadd.f32 %v19_v13, %v18_v12  ;;  %s128_s20 = sshll.u32 %s209_s1, 4  ;;  %s129_s20 = int_to_ptr.vmem [resolvable:$true] %s128_s20 }
   0xb   :  { %163 = vmatprep.subr.mxu0 %v207_v1  ;;  %v136_v17 = vld [vmem:[%s289_s3] ss:$0 sm:$0xff]  ;;  %s185_s2 = scalar_lea.vmem %s129_s20, 128  ;;  %p190_p1 = scmp.lt.s32.totalorder %s129_s20, %s129_s20 }
   0xc   :  { %164 = vmatpush3.msra.mxu0 %v27_v6  ;;  %p186_p0 = scmp.ne.s32.totalorder %s129_s20, %s185_s2  ;;  %p191_p2 = scmp.lt.s32.totalorder %s185_s2, %s185_s2 }
   0xd   :  { %165 = vmatprep.subr.mxu0 %v207_v1 }
   0xe   :  { %166 = vmatpush3.msra.mxu0 %v26_v7  ;;  %p192_p3 = por %p191_p2, %p190_p1 }
   0xf   :  { %167 = vmatprep.subr.mxu0 %v207_v1 }
  0x10   :  { %168 = vmatpush3.msra.mxu0 %v25_v8  ;;  %p193_p4 = pnand %p192_p3, %p186_p0 }
  0x11   :  { %169 = vmatprep.subr.mxu0 %v207_v1 }
  0x12   :  { %170 = vmatpush3.msra.mxu0 %v24_v9 }
  0x13   :  { %171 = vmatprep.subr.mxu0 %v207_v1 }
  0x14   :  { %172 = vmatpush3.msra.mxu0 %v23_v10 }
  0x15   :  { %173 = vmatprep.subr.mxu0 %v207_v1 }
  0x16   :  { %174 = vmatpush3.msra.mxu0 %v22_v11 }
  0x17   :  { %175 = vmatprep.subr.mxu0 %v207_v1 }
  0x18   :  { %176 = vmatpush3.msra.mxu0 %v21_v14 }
  0x19   :  { %177 = vmatprep.subr.mxu0 %v207_v1 }
  0x1a   :  { %178 = vmatpush3.msra.mxu0 %v20_v15 }
  0x1b   :  { %180 = vmatmul.mubr.msk.f32.vlgmr.msra.gmra.mxu0 %vm41_vm2, %v34_v16 }
  0xdb   :  { %v115_v18 = vpop.f32.mrf.mxu0 }
  0xdc   :  { %v116_v19 = vadd.f32 %v136_v17, %v115_v18 }
  0xdd   :  { %v181_v20 = vpop.f32.mrf.mxu0 }
  0xde   :  { %v119_v21 = vmax.f32 %v116_v19, 0.0 }
  0xe0   :  { %121 = vst.msk [vmem:[#allocation2] sm:$0xff] %vm120_vm3, %v119_v21 }
  0xe1   :  { %196 = shalt.err (!%p193_p4)
}
  0xe2   :  { %131 = dma.vmem_to_hbm [thread:$0]  %s129_s20, 128, %s290_s4, [#allocation3]  }
  0xe3   :  { %205 = dma.done.wait [#allocation3], 128  }
  0xe4   :  { %206 = vsyncadd [#allocation3], 4294967168 }
  0xe5   :  { %135 = vsyncpa [#allocation3], 1 }

</bundles_post_ra>
